<compile_context>
chip_gen: v6e
topology: v6e:2x2x1
jax: 0.10.0
libtpu: 0.0.40
codegen_flags: <defaults>
</compile_context>

<pallas_src>
import functools

import jax
import jax.numpy as jnp
from jax.experimental import pallas as pl
from jax.experimental.pallas import tpu as pltpu

LANES = 128
SUB_ROWS = 64             # inner-chunk & accumulator rows (8 f32 vregs each)
MAX_ROWS_PER_TILE = 2048  # 2048 x 128 x 4B = 1 MiB f32 per input per block


def _round_up(x, m):
    return ((x + m - 1) // m) * m


def _min_sublanes(dtype):
    """Minimum second-to-last block dim for this dtype's sublane packing."""
    bits = jnp.dtype(dtype).itemsize * 8
    if bits >= 32:
        return 8
    if bits == 16:
        return 16
    return 32


@functools.lru_cache(maxsize=1)
def _num_tensorcores():
    """Best-effort TensorCore count (v5e/v6e: 1, v7x: 2). Falls back to 2,
    which is correct everywhere and nearly free now that duplicated tiles are
    skipped in-kernel."""
    try:
        info = pltpu.get_tpu_info()
    except Exception:
        return 2
    for name in ("num_cores", "core_count", "num_tensorcores",
                 "tensorcore_count", "cores_per_chip", "num_cores_per_chip"):
        v = getattr(info, name, None)
        if v is None:
            continue
        try:
            v = int(v)
        except (TypeError, ValueError):
            continue
        if 1 <= v <= 16:
            return v
    return 2


def _jaccard_kernel(pr_ref, gt_ref, out_ref, acc_i_ref, acc_t_ref, *,
                    rows_total, rows_per_tile, sub_rows, tiles_total):
    s = pl.program_id(0)                 # shard (parallel -> per-TC on v7x)
    j = pl.program_id(1)                 # tile within shard (reduction, last)
    tps = pl.num_programs(1)
    t = s * tps + j                      # logical tile index (matches in_map
                                         # for every non-clamped tile)
    full_tiles = rows_total // rows_per_tile   # tiles with no out-of-range rows
    n_sub = rows_per_tile // sub_rows

    @pl.when(j == 0)
    def _init():
        acc_i_ref[...] = jnp.zeros_like(acc_i_ref)
        acc_t_ref[...] = jnp.zeros_like(acc_t_ref)

    def accumulate(masked):
        row0 = t * rows_per_tile         # first logical row of this tile

        def body(k, carry):
            acc_i, acc_t = carry
            off = pl.multiple_of(k * sub_rows, sub_rows)
            x = pr_ref[pl.ds(off, sub_rows), :].astype(jnp.float32)
            g = gt_ref[pl.ds(off, sub_rows), :].astype(jnp.float32)
            # sigmoid via a single EUP transcendental (tanh), no exp + divide.
            p = 0.5 * (1.0 + jnp.tanh(0.5 * x))
            if masked:
                # Row-index mask only (edge tile): cheap, overflow-safe.
                r = jax.lax.broadcasted_iota(jnp.int32, (sub_rows, LANES), 0)
                valid = (row0 + off + r) < rows_total
                p = jnp.where(valid, p, 0.0)
                g = jnp.where(valid, g, 0.0)
            return acc_i + g * p, acc_t + (g + p)

        zi = jnp.zeros((sub_rows, LANES), jnp.float32)
        zt = jnp.zeros((sub_rows, LANES), jnp.float32)
        acc_i, acc_t = jax.lax.fori_loop(0, n_sub, body, (zi, zt))
        # Single accumulator RMW per grid step (not per element).
        acc_i_ref[...] += acc_i          # -> sum(gt * pr)
        acc_t_ref[...] += acc_t          # -> sum(gt) + sum(pr)

    @pl.when(t < full_tiles)
    def _interior():                     # steady state: zero masking work
        accumulate(masked=False)

    @pl.when((t >= full_tiles) & (t < tiles_total))
    def _edge():                         # single ragged tile: row mask only
        accumulate(masked=True)

    # Tiles with t >= tiles_total are clamped duplicates: skipped entirely.

    @pl.when(j == tps - 1)
    def _finalize():
        out_ref[0, 0] = jnp.sum(acc_i_ref[...])
        out_ref[0, 1] = jnp.sum(acc_t_ref[...])


def jaccard_loss(y_pr, y_gt, eps=1e-7):
    """1 - jaccard(sigmoid(y_pr), y_gt). Any matching shape (e.g. NCHW).

    Pass inputs in their native dtype (f32 / bf16 logits, float / bool / int
    targets) — the kernel upcasts in VMEM; a wrapper-side astype would add a
    full extra HBM pass.
    """
    assert y_pr.shape == y_gt.shape
    n_elem = int(y_pr.size)

    pr_flat = jnp.ravel(y_pr)            # free bitcast for contiguous inputs
    gt_flat = jnp.ravel(y_gt)

    rows = n_elem // LANES
    rem = n_elem - rows * LANES

    inter = jnp.float32(0.0)
    total = jnp.float32(0.0)

    if rows > 0:
        n_main = rows * LANES
        if rem:
            pr_main = pr_flat[:n_main]
            gt_main = gt_flat[:n_main]
        else:
            pr_main, gt_main = pr_flat, gt_flat
        pr2d = pr_main.reshape(rows, LANES)
        gt2d = gt_main.reshape(rows, LANES)

        min_rows = max(_min_sublanes(y_pr.dtype), _min_sublanes(y_gt.dtype))
        if rows >= SUB_ROWS:
            rows_per_tile = min(MAX_ROWS_PER_TILE, _round_up(rows, SUB_ROWS))
            sub_rows = SUB_ROWS
        else:
            rows_per_tile = _round_up(rows, min_rows)
            sub_rows = rows_per_tile

        tiles_total = (rows + rows_per_tile - 1) // rows_per_tile
        num_shards = max(1, min(_num_tensorcores(), tiles_total))
        tiles_per_shard = (tiles_total + num_shards - 1) // num_shards

        def in_map(s, j):
            # Clamp so no block starts fully out of bounds; the duplicated
            # (clamped) tiles are skipped inside the kernel via pl.when.
            return (jnp.minimum(s * tiles_per_shard + j, tiles_total - 1), 0)

        kernel = functools.partial(
            _jaccard_kernel,
            rows_total=rows,
            rows_per_tile=rows_per_tile,
            sub_rows=sub_rows,
            tiles_total=tiles_total,
        )

        parts = pl.pallas_call(
            kernel,
            out_shape=jax.ShapeDtypeStruct((num_shards, 2), jnp.float32),
            grid_spec=pltpu.PrefetchScalarGridSpec(
                num_scalar_prefetch=0,
                grid=(num_shards, tiles_per_shard),
                in_specs=[
                    pl.BlockSpec((rows_per_tile, LANES), in_map),
                    pl.BlockSpec((rows_per_tile, LANES), in_map),
                ],
                out_specs=pl.BlockSpec(
                    (1, 2), lambda s, j: (s, 0),
                    memory_space=pltpu.MemorySpace.SMEM,
                ),
                scratch_shapes=[
                    pltpu.VMEM((sub_rows, LANES), jnp.float32),  # sum(g*p)
                    pltpu.VMEM((sub_rows, LANES), jnp.float32),  # sum(g)+sum(p)
                ],
            ),
            compiler_params=pltpu.CompilerParams(
                dimension_semantics=("parallel", "arbitrary"),
            ),
        )(pr2d, gt2d)

        inter = inter + jnp.sum(parts[:, 0])
        total = total + jnp.sum(parts[:, 1])

    if rem:
        # <128-element ragged tail: trivial jnp epilogue (no full-array pad).
        tp = pr_flat[rows * LANES:].astype(jnp.float32)
        tg = gt_flat[rows * LANES:].astype(jnp.float32)
        ps = 0.5 * (1.0 + jnp.tanh(0.5 * tp))
        inter = inter + jnp.sum(tg * ps)
        total = total + jnp.sum(tg) + jnp.sum(ps)

    union = total - inter + jnp.float32(eps)
    return jnp.float32(1.0) - (inter + jnp.float32(eps)) / union


def _jaccard_loss_ref(y_pr, y_gt, eps=1e-7):
    pr = jax.nn.sigmoid(y_pr.astype(jnp.float32))
    gt = y_gt.astype(jnp.float32)
    inter = jnp.sum(gt * pr)
    union = jnp.sum(gt) + jnp.sum(pr) - inter + eps
    return 1.0 - (inter + eps) / union


if __name__ == "__main__":
    key = jax.random.PRNGKey(0)
    k1, k2 = jax.random.split(key)
    # NCHW: batch=2, channels=4, spatial=16x16 (logits + binary mask)
    y_pr = jax.random.normal(k1, (2, 4, 16, 16), dtype=jnp.float32)
    y_gt = (jax.random.uniform(k2, (2, 4, 16, 16)) > 0.5).astype(jnp.float32)

    loss = jax.block_until_ready(jaccard_loss(y_pr, y_gt))
    ref = jax.block_until_ready(_jaccard_loss_ref(y_pr, y_gt))

    assert jnp.allclose(loss, ref, atol=1e-5, rtol=1e-5), (loss, ref)
    print("KERNEL_OK")
</pallas_src>

<mosaic_0001>
module attributes {stable_mosaic.version = 11 : i64} {
  func.func @_jaccard_kernel(%arg0: i32, %arg1: i32, %arg2: memref<16x128xf32, #tpu.memory_space<vmem>>, %arg3: memref<16x128xf32, #tpu.memory_space<vmem>>, %arg4: memref<1x2xf32, #tpu.memory_space<smem>>, %arg5: memref<16x128xf32, #tpu.memory_space<vmem>>, %arg6: memref<16x128xf32, #tpu.memory_space<vmem>>) attributes {dimension_semantics = [#tpu.dimension_semantics<parallel>, #tpu.dimension_semantics<arbitrary>], iteration_bounds = array<i64: 1, 1>, scalar_prefetch = 0 : i64, scratch_operands = 2 : i64, tpu.core_type = #tpu.core_type<tc>, window_params = [{transform_indices = @transform_0, window_bounds = array<i64: 16, 128>}, {transform_indices = @transform_1, window_bounds = array<i64: 16, 128>}, {transform_indices = @transform_2, window_bounds = array<i64: 1, 2>}]} {
    %c1_i32 = arith.constant 1 : i32
    %0 = arith.muli %arg0, %c1_i32 : i32
    %1 = arith.addi %0, %arg1 : i32
    %c0_i32 = arith.constant 0 : i32
    %2 = arith.cmpi eq, %arg1, %c0_i32 : i32
    %3 = arith.extui %2 : i1 to i32
    %c0_i32_0 = arith.constant 0 : i32
    %4 = arith.cmpi ne, %3, %c0_i32_0 : i32
    scf.if %4 {
      %cst = arith.constant 0.000000e+00 : f32
      %16 = vector.broadcast %cst : f32 to vector<16x128xf32>
      %c0 = arith.constant 0 : index
      %c0_8 = arith.constant 0 : index
      %17 = vector.load %arg5[%c0, %c0_8] : memref<16x128xf32, #tpu.memory_space<vmem>>, vector<16x128xf32>
      tpu.vector_store %arg5[%c0, %c0_8], %16 {strides = array<i32>} : memref<16x128xf32, #tpu.memory_space<vmem>>, vector<16x128xf32>,
      %cst_9 = arith.constant 0.000000e+00 : f32
      %18 = vector.broadcast %cst_9 : f32 to vector<16x128xf32>
      %c0_10 = arith.constant 0 : index
      %c0_11 = arith.constant 0 : index
      %19 = vector.load %arg6[%c0_10, %c0_11] : memref<16x128xf32, #tpu.memory_space<vmem>>, vector<16x128xf32>
      tpu.vector_store %arg6[%c0_10, %c0_11], %18 {strides = array<i32>} : memref<16x128xf32, #tpu.memory_space<vmem>>, vector<16x128xf32>,
    } else {
    }
    %c1_i32_1 = arith.constant 1 : i32
    %5 = arith.cmpi slt, %1, %c1_i32_1 : i32
    %6 = arith.extui %5 : i1 to i32
    %c0_i32_2 = arith.constant 0 : i32
    %7 = arith.cmpi ne, %6, %c0_i32_2 : i32
    scf.if %7 {
      %cst = arith.constant 0.000000e+00 : f32
      %16 = vector.broadcast %cst : f32 to vector<16x128xf32>
      %cst_8 = arith.constant 0.000000e+00 : f32
      %17 = vector.broadcast %cst_8 : f32 to vector<16x128xf32>
      %c0_i32_9 = arith.constant 0 : i32
      %c16_i32 = arith.constant 16 : i32
      %18 = arith.muli %c0_i32_9, %c16_i32 : i32
      %19 = tpu.assume_multiple %18, 16 : i32
      %20 = arith.index_cast %19 : i32 to index
      %c0 = arith.constant 0 : index
      %21 = vector.load %arg2[%20, %c0] : memref<16x128xf32, #tpu.memory_space<vmem>>, vector<16x128xf32>
      %22 = arith.index_cast %19 : i32 to index
      %c0_10 = arith.constant 0 : index
      %23 = vector.load %arg3[%22, %c0_10] : memref<16x128xf32, #tpu.memory_space<vmem>>, vector<16x128xf32>
      %cst_11 = arith.constant 5.000000e-01 : f32
      %24 = vector.broadcast %cst_11 : f32 to vector<16x128xf32>
      %25 = arith.mulf %24, %21 : vector<16x128xf32>
      %26 = math.tanh %25 : vector<16x128xf32>
      %cst_12 = arith.constant 1.000000e+00 : f32
      %27 = vector.broadcast %cst_12 : f32 to vector<16x128xf32>
      %28 = arith.addf %27, %26 : vector<16x128xf32>
      %cst_13 = arith.constant 5.000000e-01 : f32
      %29 = vector.broadcast %cst_13 : f32 to vector<16x128xf32>
      %30 = arith.mulf %29, %28 : vector<16x128xf32>
      %31 = arith.mulf %23, %30 : vector<16x128xf32>
      %32 = arith.addf %16, %31 : vector<16x128xf32>
      %33 = arith.addf %23, %30 : vector<16x128xf32>
      %34 = arith.addf %17, %33 : vector<16x128xf32>
      %c1_i32_14 = arith.constant 1 : i32
      %c0_15 = arith.constant 0 : index
      %c0_16 = arith.constant 0 : index
      %35 = vector.load %arg5[%c0_15, %c0_16] : memref<16x128xf32, #tpu.memory_space<vmem>>, vector<16x128xf32>
      %36 = arith.addf %35, %32 : vector<16x128xf32>
      %c0_17 = arith.constant 0 : index
      %c0_18 = arith.constant 0 : index
      %37 = vector.load %arg5[%c0_17, %c0_18] : memref<16x128xf32, #tpu.memory_space<vmem>>, vector<16x128xf32>
      tpu.vector_store %arg5[%c0_17, %c0_18], %36 {strides = array<i32>} : memref<16x128xf32, #tpu.memory_space<vmem>>, vector<16x128xf32>,
      %c0_19 = arith.constant 0 : index
      %c0_20 = arith.constant 0 : index
      %38 = vector.load %arg6[%c0_19, %c0_20] : memref<16x128xf32, #tpu.memory_space<vmem>>, vector<16x128xf32>
      %39 = arith.addf %38, %34 : vector<16x128xf32>
      %c0_21 = arith.constant 0 : index
      %c0_22 = arith.constant 0 : index
      %40 = vector.load %arg6[%c0_21, %c0_22] : memref<16x128xf32, #tpu.memory_space<vmem>>, vector<16x128xf32>
      tpu.vector_store %arg6[%c0_21, %c0_22], %39 {strides = array<i32>} : memref<16x128xf32, #tpu.memory_space<vmem>>, vector<16x128xf32>,
    } else {
    }
    %c1_i32_3 = arith.constant 1 : i32
    %8 = arith.cmpi sge, %1, %c1_i32_3 : i32
    %c1_i32_4 = arith.constant 1 : i32
    %9 = arith.cmpi slt, %1, %c1_i32_4 : i32
    %10 = arith.andi %8, %9 : i1
    %11 = arith.extui %10 : i1 to i32
    %c0_i32_5 = arith.constant 0 : i32
    %12 = arith.cmpi ne, %11, %c0_i32_5 : i32
    scf.if %12 {
      %c16_i32 = arith.constant 16 : i32
      %16 = arith.muli %1, %c16_i32 : i32
      %cst = arith.constant 0.000000e+00 : f32
      %17 = vector.broadcast %cst : f32 to vector<16x128xf32>
      %cst_8 = arith.constant 0.000000e+00 : f32
      %18 = vector.broadcast %cst_8 : f32 to vector<16x128xf32>
      %c0_i32_9 = arith.constant 0 : i32
      %c16_i32_10 = arith.constant 16 : i32
      %19 = arith.muli %c0_i32_9, %c16_i32_10 : i32
      %20 = tpu.assume_multiple %19, 16 : i32
      %21 = arith.index_cast %20 : i32 to index
      %c0 = arith.constant 0 : index
      %22 = vector.load %arg2[%21, %c0] : memref<16x128xf32, #tpu.memory_space<vmem>>, vector<16x128xf32>
      %23 = arith.index_cast %20 : i32 to index
      %c0_11 = arith.constant 0 : index
      %24 = vector.load %arg3[%23, %c0_11] : memref<16x128xf32, #tpu.memory_space<vmem>>, vector<16x128xf32>
      %cst_12 = arith.constant 5.000000e-01 : f32
      %25 = vector.broadcast %cst_12 : f32 to vector<16x128xf32>
      %26 = arith.mulf %25, %22 : vector<16x128xf32>
      %27 = math.tanh %26 : vector<16x128xf32>
      %cst_13 = arith.constant 1.000000e+00 : f32
      %28 = vector.broadcast %cst_13 : f32 to vector<16x128xf32>
      %29 = arith.addf %28, %27 : vector<16x128xf32>
      %cst_14 = arith.constant 5.000000e-01 : f32
      %30 = vector.broadcast %cst_14 : f32 to vector<16x128xf32>
      %31 = arith.mulf %30, %29 : vector<16x128xf32>
      %32 = tpu.iota {dimensions = array<i32: 0>} : vector<16x128xi32>
      %33 = arith.addi %16, %20 : i32
      %34 = vector.broadcast %33 : i32 to vector<16x128xi32>
      %35 = arith.addi %34, %32 : vector<16x128xi32>
      %c16_i32_15 = arith.constant 16 : i32
      %36 = vector.broadcast %c16_i32_15 : i32 to vector<16x128xi32>
      %37 = arith.cmpi slt, %35, %36 : vector<16x128xi32>
      %cst_16 = arith.constant 0.000000e+00 : f32
      %38 = vector.broadcast %cst_16 : f32 to vector<16x128xf32>
      %39 = arith.select %37, %31, %38 : vector<16x128xi1>, vector<16x128xf32>
      %cst_17 = arith.constant 0.000000e+00 : f32
      %40 = vector.broadcast %cst_17 : f32 to vector<16x128xf32>
      %41 = arith.select %37, %24, %40 : vector<16x128xi1>, vector<16x128xf32>
      %42 = arith.mulf %41, %39 : vector<16x128xf32>
      %43 = arith.addf %17, %42 : vector<16x128xf32>
      %44 = arith.addf %41, %39 : vector<16x128xf32>
      %45 = arith.addf %18, %44 : vector<16x128xf32>
      %c1_i32_18 = arith.constant 1 : i32
      %c0_19 = arith.constant 0 : index
      %c0_20 = arith.constant 0 : index
      %46 = vector.load %arg5[%c0_19, %c0_20] : memref<16x128xf32, #tpu.memory_space<vmem>>, vector<16x128xf32>
      %47 = arith.addf %46, %43 : vector<16x128xf32>
      %c0_21 = arith.constant 0 : index
      %c0_22 = arith.constant 0 : index
      %48 = vector.load %arg5[%c0_21, %c0_22] : memref<16x128xf32, #tpu.memory_space<vmem>>, vector<16x128xf32>
      tpu.vector_store %arg5[%c0_21, %c0_22], %47 {strides = array<i32>} : memref<16x128xf32, #tpu.memory_space<vmem>>, vector<16x128xf32>,
      %c0_23 = arith.constant 0 : index
      %c0_24 = arith.constant 0 : index
      %49 = vector.load %arg6[%c0_23, %c0_24] : memref<16x128xf32, #tpu.memory_space<vmem>>, vector<16x128xf32>
      %50 = arith.addf %49, %45 : vector<16x128xf32>
      %c0_25 = arith.constant 0 : index
      %c0_26 = arith.constant 0 : index
      %51 = vector.load %arg6[%c0_25, %c0_26] : memref<16x128xf32, #tpu.memory_space<vmem>>, vector<16x128xf32>
      tpu.vector_store %arg6[%c0_25, %c0_26], %50 {strides = array<i32>} : memref<16x128xf32, #tpu.memory_space<vmem>>, vector<16x128xf32>,
    } else {
    }
    %c0_i32_6 = arith.constant 0 : i32
    %13 = arith.cmpi eq, %arg1, %c0_i32_6 : i32
    %14 = arith.extui %13 : i1 to i32
    %c0_i32_7 = arith.constant 0 : i32
    %15 = arith.cmpi ne, %14, %c0_i32_7 : i32
    scf.if %15 {
      %c0 = arith.constant 0 : index
      %c0_8 = arith.constant 0 : index
      %16 = vector.load %arg5[%c0, %c0_8] : memref<16x128xf32, #tpu.memory_space<vmem>>, vector<16x128xf32>
      %17 = vector.shape_cast %16 : vector<16x128xf32> to vector<1x16x128xf32>
      %cst = arith.constant dense<0.000000e+00> : vector<1xf32>
      %18 = vector.multi_reduction <add>, %17, %cst [1, 2] : vector<1x16x128xf32> to vector<1xf32>
      %19 = vector.shape_cast %18 : vector<1xf32> to vector<1x1x1xf32>
      %20 = vector.extract %19[0, 0, 0] : f32 from vector<1x1x1xf32>
      %c0_9 = arith.constant 0 : index
      %c0_10 = arith.constant 0 : index
      %21 = memref.load %arg4[%c0_9, %c0_10] : memref<1x2xf32, #tpu.memory_space<smem>>
      memref.store %20, %arg4[%c0_9, %c0_10] : memref<1x2xf32, #tpu.memory_space<smem>>
      %c0_11 = arith.constant 0 : index
      %c0_12 = arith.constant 0 : index
      %22 = vector.load %arg6[%c0_11, %c0_12] : memref<16x128xf32, #tpu.memory_space<vmem>>, vector<16x128xf32>
      %23 = vector.shape_cast %22 : vector<16x128xf32> to vector<1x16x128xf32>
      %cst_13 = arith.constant dense<0.000000e+00> : vector<1xf32>
      %24 = vector.multi_reduction <add>, %23, %cst_13 [1, 2] : vector<1x16x128xf32> to vector<1xf32>
      %25 = vector.shape_cast %24 : vector<1xf32> to vector<1x1x1xf32>
      %26 = vector.extract %25[0, 0, 0] : f32 from vector<1x1x1xf32>
      %c0_14 = arith.constant 0 : index
      %c1 = arith.constant 1 : index
      %27 = memref.load %arg4[%c0_14, %c1] : memref<1x2xf32, #tpu.memory_space<smem>>
      memref.store %26, %arg4[%c0_14, %c1] : memref<1x2xf32, #tpu.memory_space<smem>>
    } else {
    }
    return
  }
  func.func @transform_0(%arg0: i32, %arg1: i32) -> (i32, i32) {
    %c1_i32 = arith.constant 1 : i32
    %0 = arith.muli %arg0, %c1_i32 : i32
    %1 = arith.addi %0, %arg1 : i32
    %c0_i32 = arith.constant 0 : i32
    %2 = arith.minsi %1, %c0_i32 : i32
    %c0_i32_0 = arith.constant 0 : i32
    %c0_i32_1 = arith.constant 0 : i32
    return %2, %c0_i32_0 : i32, i32
  }
  func.func @transform_1(%arg0: i32, %arg1: i32) -> (i32, i32) {
    %c1_i32 = arith.constant 1 : i32
    %0 = arith.muli %arg0, %c1_i32 : i32
    %1 = arith.addi %0, %arg1 : i32
    %c0_i32 = arith.constant 0 : i32
    %2 = arith.minsi %1, %c0_i32 : i32
    %c0_i32_0 = arith.constant 0 : i32
    %c0_i32_1 = arith.constant 0 : i32
    return %2, %c0_i32_0 : i32, i32
  }
  func.func @transform_2(%arg0: i32, %arg1: i32) -> (i32, i32) {
    %c0_i32 = arith.constant 0 : i32
    %c0_i32_0 = arith.constant 0 : i32
    return %arg0, %c0_i32 : i32, i32
  }
}

</mosaic_0001>

<bundles_post_ra>
// kernel: tpu_custom_call.1
= control target key start
LH: loop header
LB: loop body
LE: loop exit
PB: predicated region body
PF: predicated region fallthrough
CT: control target
= control target key end

     0   :  { %7 = vsyncpa [#allocation5], 0  ;;  %s302_s0 = inlined_call_operand.hbm [shape: f32[16,128], index: 0, kind: input, shape index: {}]   ;;  %s303_s1 = inlined_call_operand.hbm [shape: f32[16,128], index: 1, kind: input, shape index: {}]   ;;  %s304_s2 = inlined_call_operand.hbm [shape: f32[1,2], index: 2, kind: output, shape index: {}]  }
   0x1   :  { %8 = vsyncpa [#allocation8], 0 }
   0x2   :  { %9 = vsyncpa [#allocation6], 0  ;;  %s273_s9 = smov [#allocation4]  }
   0x3   :  { %s21_s10 = sshll.u32 %s273_s9, 4  ;;  %s22_s10 = int_to_ptr.vmem [resolvable:$true] %s21_s10 }
   0x4   :  { %s227_s11 = scalar_lea.vmem %s22_s10, 256  ;;  %p232_p1 = scmp.lt.s32.totalorder %s22_s10, %s22_s10 }
   0x5   :  { %p228_p0 = scmp.ne.s32.totalorder %s22_s10, %s227_s11  ;;  %p233_p2 = scmp.lt.s32.totalorder %s227_s11, %s227_s11 }
   0x7   :  { %p234_p3 = por %p233_p2, %p232_p1 }
   0x9   :  { %p235_p4 = pnand %p234_p3, %p228_p0 }
   0xb   :  { %238 = shalt.err (!%p235_p4)
}
   0xc   :  { %s274_s12 = smov 128   ;;  %s275_s13 = smov 8  }
   0xd   :  { %27 = dma.hbm_to_vmem [thread:$0]  %s302_s0, 256, %s22_s10, [#allocation5], %s274_s12, %s274_s12, %s275_s13  }
   0xe   :  { %s276_s16 = smov [#allocation7]  }
   0xf   :  { %s39_s17 = sshll.u32 %s276_s16, 4  ;;  %s40_s17 = int_to_ptr.vmem [resolvable:$true] %s39_s17 }
  0x10   :  { %s247_s18 = scalar_lea.vmem %s40_s17, 256  ;;  %p252_p6 = scmp.lt.s32.totalorder %s40_s17, %s40_s17 }
  0x11   :  { %p248_p5 = scmp.ne.s32.totalorder %s40_s17, %s247_s18  ;;  %p253_p7 = scmp.lt.s32.totalorder %s247_s18, %s247_s18 }
  0x13   :  { %p254_p8 = por %p253_p7, %p252_p6 }
  0x15   :  { %p255_p9 = pnand %p254_p8, %p248_p5 }
  0x17   :  { %258 = shalt.err (!%p255_p9)
}
  0x18   :  { %45 = dma.hbm_to_vmem [thread:$0]  %s303_s1, 256, %s40_s17, [#allocation8], %s274_s12, %s274_s12, %s275_s13  }
  0x19   :  { %267 = dma.done.wait [#allocation5], 256  }
  0x1a   :  { %268 = vsyncadd [#allocation5], 4294967040 }
  0x1b   :  { %269 = dma.done.wait [#allocation8], 256  }
  0x1c   :  { %270 = vsyncadd [#allocation8], 4294967040  ;;  %v73_v0 = vld [vmem:[#allocation4] sm:$0xff]  ;;  %v74_v1 = vld [vmem:[#allocation4 + $0x8] sm:$0xff]  ;;  %s277_s21 = smov [#allocation9]  }
  0x1d   :  { %v77_v2 = vmul.f32 0.5, %v73_v0  ;;  %v78_v3 = vmul.f32 0.5, %v74_v1  ;;  %v75_v7 = vld [vmem:[#allocation7] sm:$0xff]  ;;  %v76_v9 = vld [vmem:[#allocation7 + $0x8] sm:$0xff] }
  0x1f   :  { %215 = vtanh.f32 %v77_v2 }
  0x20   :  { %217 = vtanh.f32 %v78_v3 }
  0x2c   :  { %v216_v4 = vpop.eup %215 }
  0x2d   :  { %v218_v5 = vpop.eup %217  ;;  %v81_v6 = vadd.f32 1.0, %v216_v4 }
  0x2e   :  { %v82_v8 = vadd.f32 1.0, %v218_v5 }
  0x2f   :  { %v83_v10 = vmul.f32 0.5, %v81_v6 }
  0x30   :  { %v84_v11 = vmul.f32 0.5, %v82_v8 }
  0x31   :  { %v85_v12 = vmul.f32 %v83_v10, %v75_v7  ;;  %v89_v14 = vadd.f32 %v83_v10, %v75_v7 }
  0x32   :  { %v86_v13 = vmul.f32 %v84_v11, %v76_v9  ;;  %v90_v15 = vadd.f32 %v84_v11, %v76_v9 }
  0x34   :  { %v161_v16 = vadd.f32 %v86_v13, %v85_v12  ;;  %v175_v17 = vadd.f32 %v90_v15, %v89_v14 }
  0x36   :  { %162 = vadd.xlane.f32.xlu0 %v161_v16 }
  0x3a   :  { %176 = vadd.xlane.f32.xlu0 %v175_v17 }
  0xbf   :  { %v163_v18 = vpop.xlane.xlu0 %162 }
  0xc0   :  { %v164_v19 = vrot.slane %v163_v18, 4 }
  0xc2   :  { %v165_v20 = vadd.f32 %v164_v19, %v163_v18 }
  0xc3   :  { %v177_v21 = vpop.xlane.xlu0 %176 }
  0xc4   :  { %v166_v22 = vrot.slane %v165_v20, 2  ;;  %v178_v23 = vrot.slane %v177_v21, 4 }
  0xc6   :  { %v179_v24 = vadd.f32 %v178_v23, %v177_v21  ;;  %v167_v25 = vadd.f32 %v166_v22, %v165_v20 }
  0xc8   :  { %v180_v26 = vrot.slane %v179_v24, 2  ;;  %v168_v27 = vrot.slane %v167_v25, 1 }
  0xca   :  { %v181_v28 = vadd.f32 %v180_v26, %v179_v24  ;;  %v169_v29 = vadd.f32 %v168_v27, %v167_v25 }
  0xcc   :  { %206 = vpush %v169_v29  ;;  %v182_v30 = vrot.slane %v181_v28, 1 }
  0xce   :  { %v183_v31 = vadd.f32 %v182_v30, %v181_v28 }
  0xd0   :  { %208 = vpush %v183_v31 }
  0xfd   :  { %s207_s0 = spop %206 }
  0xfe   :  { %172 = sst [smem:[#allocation9]] %s207_s0 }
 0x101   :  { %s209_s1 = spop %208 }
 0x102   :  { %186 = sst [smem:[#allocation9 + $0x1]] %s209_s1 }
 0x103   :  { %194 = dma.smem_to_hbm %s277_s21, 16, %s304_s2, [#allocation6]  }
 0x104   :  { %271 = dma.done.wait [#allocation6], 16  }
 0x105   :  { %272 = vsyncadd [#allocation6], 4294967280 }
 0x106   :  { %198 = sfence }
 0x107   :  { %199 = vsyncpa [#allocation5], 1 }
 0x108   :  { %200 = vsyncpa [#allocation8], 1 }
 0x109   :  { %201 = vsyncpa [#allocation6], 1 }

</bundles_post_ra>
